<compile_context>
chip_gen: v6e
topology: v6e:2x2x1
jax: 0.10.0
libtpu: 0.0.40
codegen_flags: <defaults>
</compile_context>

<pallas_src>
import functools
import math

import jax
import jax.numpy as jnp
from jax.experimental import pallas as pl
from jax.experimental.pallas import tpu as pltpu


def mha_kernel(q_in_ref, ctx_ref, wq_ref, wkv_ref, wo_ref, out_ref,
               k_scr, v_scr, *, num_heads, attn_dim, scale, compute_dtype,
               approx_reciprocal):
    """One grid step = (batch b, query tile i).

    The K/V projection and its head-major relayout run only on the first
    query tile of each batch and persist in VMEM scratch (H, Lk, A)."""
    H, A = num_heads, attn_dim
    D = H * A
    cdt = compute_dtype
    TQ = q_in_ref.shape[1]
    Lk = ctx_ref.shape[1]

    # ---- hoisted K/V projection: once per batch ---------------------------
    @pl.when(pl.program_id(1) == 0)
    def _():
        x_c = ctx_ref[0].astype(cdt)                                  # (Lk, D)
        kv = jnp.dot(x_c, wkv_ref[...].astype(cdt),
                     preferred_element_type=jnp.float32)              # (Lk, 2D)
        # Explicit head-major relayout, done once (not per query tile).
        kh = jnp.transpose(kv[:, :D].reshape(Lk, H, A), (1, 0, 2))    # (H, Lk, A)
        vh = jnp.transpose(kv[:, D:].reshape(Lk, H, A), (1, 0, 2))    # (H, Lk, A)
        k_scr[...] = kh.astype(cdt)
        v_scr[...] = vh.astype(cdt)

    # ---- per-query-tile work ----------------------------------------------
    x_q = q_in_ref[0].astype(cdt)                                     # (TQ, D)
    # Q projection; softmax scale folded into q (TQ*D mults, not H*TQ*Lk).
    q = jnp.dot(x_q, wq_ref[...].astype(cdt),
                preferred_element_type=jnp.float32) * scale           # (TQ, D)
    qh = jnp.transpose(q.reshape(TQ, H, A), (1, 0, 2)).astype(cdt)    # (H, TQ, A)

    kh = k_scr[...]                                                   # (H, Lk, A)
    vh = v_scr[...]                                                   # (H, Lk, A)

    # Scores for all heads with ONE batched contraction (contraction on the
    # lane axis of both operands -> no hidden per-step K relayout).
    s = jnp.einsum("hqa,hka->hqk", qh, kh,
                   preferred_element_type=jnp.float32)                # (H, TQ, Lk)

    # TODO(synk): additive attention mask would be added to `s` here.
    # TODO(synk): flash-style Lk-tiled online softmax for long context.
    s = s - jnp.max(s, axis=-1, keepdims=True)
    p = jnp.exp(s)                                                    # (H, TQ, Lk)
    l = jnp.sum(p, axis=-1, keepdims=True)                            # (H, TQ, 1)

    # PV on the UN-normalized probabilities; normalize the (H, TQ, A) result
    # instead of the (H, TQ, Lk) tensor (deferred normalization).
    e = jnp.einsum("hqk,hka->hqa", p.astype(cdt), vh,
                   preferred_element_type=jnp.float32)                # (H, TQ, A)
    e = e * pl.reciprocal(l, approx=approx_reciprocal)
    e = jnp.transpose(e, (1, 0, 2)).reshape(TQ, D)                    # (TQ, D)

    out = jnp.dot(e.astype(cdt), wo_ref[...].astype(cdt),
                  preferred_element_type=jnp.float32)
    out_ref[0] = out.astype(out_ref.dtype)


def _vmem_budget_bytes():
    """Generation-aware budget: 7/8 of physical per-core VMEM
    (~56 MiB on v7x, ~112 MiB on v5e/v6e); headroom left for Mosaic
    internal scratch / semaphores."""
    try:
        cap = int(pltpu.get_tpu_info().vmem_capacity_bytes)
    except Exception:
        cap = 64 << 20   # conservative (v7x-sized) fallback
    return (cap * 7) // 8


def _pad(n, m=128):
    return -(-n // m) * m


def _estimate_vmem_bytes(TQ, Lk, D, H, A, x_isz, w_isz, cdt_isz):
    # Query / output tiles: double-buffered by the pipeline.
    qo = 2 * 2 * TQ * _pad(D) * x_isz
    # Context + weights: single-buffered (pl.Buffered(1)).
    cw = (_pad(Lk, 8) * _pad(D) * x_isz
          + (D * _pad(D) + D * _pad(2 * D) + D * _pad(D)) * w_isz)
    # Head-major K/V scratch (lane dim A pads to 128).
    kv = 2 * H * _pad(Lk, 8) * _pad(A) * cdt_isz
    # f32 in-kernel intermediates: scores + probs dominate, plus q/kv/e slabs.
    interm = 4 * (2 * H * TQ * _pad(Lk) + 3 * TQ * _pad(D)
                  + _pad(Lk, 8) * _pad(2 * D) + 2 * H * TQ * _pad(A))
    return qo + cw + kv + interm


def _pick_q_tile(Lq, Lk, D, H, A, x_isz, w_isz, cdt_isz, budget):
    # Prefer the whole sequence; otherwise the largest MXU-friendly
    # (128/256-multiple) divisor whose estimated footprint fits the budget.
    cands = [Lq] + [t for t in (1024, 512, 256, 128) if t < Lq and Lq % t == 0]
    for t in cands:
        if _estimate_vmem_bytes(t, Lk, D, H, A, x_isz, w_isz, cdt_isz) <= budget:
            return t
    return cands[-1]


def multi_head_attention(query, context, wq, wkv, wo, *, num_heads,
                         compute_dtype=None, q_tile=None,
                         approx_reciprocal=False):
    """query: (B, Lq, D), context: (B, Lk, D).
    wq: (D, D), wkv: (D, 2D), wo: (D, D) -- stored [in, out] so x @ W applies.

    compute_dtype: MXU operand dtype (jnp.bfloat16 recommended on v6e/v7x);
    accumulation and softmax stay in f32. Passing bf16 weights/context arrays
    additionally halves their DMA + VMEM footprint."""
    B, Lq, D = query.shape
    _, Lk, _ = context.shape
    assert D % num_heads == 0
    A = D // num_heads
    scale = 1.0 / math.sqrt(D)   # module uses 1/sqrt(hidden_dim), not 1/sqrt(attn_dim)
    cdt = jnp.dtype(compute_dtype) if compute_dtype is not None else query.dtype

    budget = _vmem_budget_bytes()
    x_isz = query.dtype.itemsize
    w_isz = wq.dtype.itemsize
    TQ = q_tile if q_tile is not None else _pick_q_tile(
        Lq, Lk, D, num_heads, A, x_isz, w_isz, cdt.itemsize, budget)
    assert Lq % TQ == 0, "Lq must be divisible by the query tile"

    est = _estimate_vmem_bytes(TQ, Lk, D, num_heads, A, x_isz, w_isz, cdt.itemsize)
    vmem_limit = int(min(max(int(1.15 * est), 32 << 20), budget))

    kernel = functools.partial(
        mha_kernel, num_heads=num_heads, attn_dim=A, scale=scale,
        compute_dtype=cdt, approx_reciprocal=approx_reciprocal)

    single = pl.Buffered(1)   # no second buffer for (near-)grid-invariant blocks

    flops = (2 * B * Lq * D * D                     # Q projection
             + 2 * B * Lk * D * (2 * D)             # KV projection (once per batch)
             + 2 * B * Lq * D * D                   # output projection
             + 4 * B * num_heads * Lq * Lk * A)     # QK^T + PV
    bytes_accessed = ((2 * query.size + context.size) * x_isz
                      + (wq.size + wkv.size + wo.size) * w_isz)
    cost = pl.CostEstimate(flops=flops,
                           transcendentals=B * num_heads * Lq * Lk,
                           bytes_accessed=bytes_accessed)

    return pl.pallas_call(
        kernel,
        out_shape=jax.ShapeDtypeStruct((B, Lq, D), query.dtype),
        grid_spec=pltpu.PrefetchScalarGridSpec(
            num_scalar_prefetch=0,
            grid=(B, Lq // TQ),
            in_specs=[
                pl.BlockSpec((1, TQ, D), lambda b, i: (b, i, 0)),       # query tile
                pl.BlockSpec((1, Lk, D), lambda b, i: (b, 0, 0),        # full context
                             pipeline_mode=single),
                pl.BlockSpec((D, D), lambda b, i: (0, 0),               # Wq^T
                             pipeline_mode=single),
                pl.BlockSpec((D, 2 * D), lambda b, i: (0, 0),           # Wkv^T
                             pipeline_mode=single),
                pl.BlockSpec((D, D), lambda b, i: (0, 0),               # Wout^T
                             pipeline_mode=single),
            ],
            out_specs=pl.BlockSpec((1, TQ, D), lambda b, i: (b, i, 0)),
            scratch_shapes=[
                pltpu.VMEM((num_heads, Lk, A), cdt),    # K scratch, head-major
                pltpu.VMEM((num_heads, Lk, A), cdt),    # V scratch, head-major
            ],
        ),
        compiler_params=pltpu.CompilerParams(
            # B "parallel" (megacore); Lq must be "arbitrary" because the
            # hoisted K/V scratch is reused across query tiles of one batch.
            dimension_semantics=("parallel", "arbitrary"),
            vmem_limit_bytes=vmem_limit),
        cost_estimate=cost,
    )(query, context, wq, wkv, wo)


def reference(query, context, wq, wkv, wo, *, num_heads):
    """Pure-JAX reference mirroring the PyTorch forward (mask=None, dropout=0)."""
    B, Lq, D = query.shape
    A = D // num_heads
    scale = 1.0 / math.sqrt(D)
    q = query @ wq
    kv = context @ wkv
    k, v = kv[..., :D], kv[..., D:]
    q = q.reshape(B, -1, num_heads, A)
    k = k.reshape(B, -1, num_heads, A)
    v = v.reshape(B, -1, num_heads, A)
    dot = jnp.einsum("bqha,bkha->bqkh", q, k)
    w = jax.nn.softmax(dot * scale, axis=2)
    e = jnp.einsum("bqvh,bvha->bqha", w, v).reshape(B, Lq, D)
    return e @ wo


if __name__ == "__main__":
    B, Lq, Lk, D, H = 2, 8, 8, 32, 4

    key = jax.random.PRNGKey(0)
    k_q, k_q2, k_c, k_wq, k_wkv, k_wo = jax.random.split(key, 6)

    query = jax.random.normal(k_q, (B, Lq, D), dtype=jnp.float32)
    context = jax.random.normal(k_c, (B, Lk, D), dtype=jnp.float32)

    # Deterministic "normal_init" of the three bias-free Linear layers.
    # PyTorch Linear weight is (out, in); stored transposed [in, out] so the
    # kernel computes x @ W directly.
    std = 0.05
    wq = (jax.random.normal(k_wq, (D, D), dtype=jnp.float32) * std).T        # (D, D)
    wkv = (jax.random.normal(k_wkv, (2 * D, D), dtype=jnp.float32) * std).T  # (D, 2D)
    wo = (jax.random.normal(k_wo, (D, D), dtype=jnp.float32) * std).T        # (D, D)

    ref = reference(query, context, wq, wkv, wo, num_heads=H)

    # f32 path.
    out = multi_head_attention(query, context, wq, wkv, wo, num_heads=H)
    out = jax.block_until_ready(out)
    assert out.shape == (B, Lq, D)
    assert jnp.allclose(out, ref, atol=1e-3, rtol=1e-3), "f32 mismatch vs reference"

    # Multi-tile path: exercises the hoisted K/V scratch reuse across query tiles.
    Lq2 = 16
    query2 = jax.random.normal(k_q2, (B, Lq2, D), dtype=jnp.float32)
    ref2 = reference(query2, context, wq, wkv, wo, num_heads=H)
    out2 = multi_head_attention(query2, context, wq, wkv, wo, num_heads=H, q_tile=8)
    out2 = jax.block_until_ready(out2)
    assert jnp.allclose(out2, ref2, atol=1e-3, rtol=1e-3), "multi-tile mismatch vs reference"

    # bf16-MXU-operand / f32-accumulate path (v6e / v7x recommendation).
    out_bf16 = multi_head_attention(query, context, wq, wkv, wo, num_heads=H,
                                    compute_dtype=jnp.bfloat16)
    out_bf16 = jax.block_until_ready(out_bf16)
    assert jnp.allclose(out_bf16, ref, atol=5e-2, rtol=5e-2), "bf16 mismatch vs reference"

    print("KERNEL_OK")
</pallas_src>

<mosaic_0001>
module attributes {stable_mosaic.version = 11 : i64} {
  func.func @mha_kernel(%arg0: i32, %arg1: i32, %arg2: memref<1x8x32xf32, #tpu.memory_space<vmem>>, %arg3: memref<1x8x32xf32, #tpu.memory_space<vmem>>, %arg4: memref<32x32xf32, #tpu.memory_space<vmem>>, %arg5: memref<32x64xf32, #tpu.memory_space<vmem>>, %arg6: memref<32x32xf32, #tpu.memory_space<vmem>>, %arg7: memref<1x8x32xf32, #tpu.memory_space<vmem>>, %arg8: memref<4x8x8xf32, #tpu.memory_space<vmem>>, %arg9: memref<4x8x8xf32, #tpu.memory_space<vmem>>) attributes {dimension_semantics = [#tpu.dimension_semantics<parallel>, #tpu.dimension_semantics<arbitrary>], iteration_bounds = array<i64: 2, 1>, scalar_prefetch = 0 : i64, scratch_operands = 2 : i64, tpu.core_type = #tpu.core_type<tc>, window_params = [{transform_indices = @transform_0, window_bounds = array<i64: 1, 8, 32>}, {pipeline_mode = #tpu.pipeline_mode<synchronous>, transform_indices = @transform_1, window_bounds = array<i64: 1, 8, 32>}, {pipeline_mode = #tpu.pipeline_mode<synchronous>, transform_indices = @transform_2, window_bounds = array<i64: 32, 32>}, {pipeline_mode = #tpu.pipeline_mode<synchronous>, transform_indices = @transform_3, window_bounds = array<i64: 32, 64>}, {pipeline_mode = #tpu.pipeline_mode<synchronous>, transform_indices = @transform_4, window_bounds = array<i64: 32, 32>}, {transform_indices = @transform_5, window_bounds = array<i64: 1, 8, 32>}]} {
    %c0_i32 = arith.constant 0 : i32
    %0 = arith.cmpi eq, %arg1, %c0_i32 : i32
    %1 = arith.extui %0 : i1 to i32
    %c0_i32_0 = arith.constant 0 : i32
    %2 = arith.cmpi ne, %1, %c0_i32_0 : i32
    scf.if %2 {
      %c0_22 = arith.constant 0 : index
      %c0_23 = arith.constant 0 : index
      %c0_24 = arith.constant 0 : index
      %32 = vector.load %arg3[%c0_22, %c0_23, %c0_24] : memref<1x8x32xf32, #tpu.memory_space<vmem>>, vector<1x8x32xf32>
      %33 = vector.shape_cast %32 : vector<1x8x32xf32> to vector<8x32xf32>
      %c0_25 = arith.constant 0 : index
      %c0_26 = arith.constant 0 : index
      %34 = vector.load %arg5[%c0_25, %c0_26] : memref<32x64xf32, #tpu.memory_space<vmem>>, vector<32x64xf32>
      %cst_27 = arith.constant dense<0.000000e+00> : vector<8x64xf32>
      %35 = tpu.matmul %33, %34, %cst_27 {dimension_numbers = #tpu.dot_dimension_numbers<[1], [0], [0], [1], [0, 0, 1, 1], [], []>} : vector<8x32xf32>, vector<32x64xf32>, vector<8x64xf32> -> vector<8x64xf32>
      %36 = vector.extract_strided_slice %35 {offsets = [0, 0], sizes = [8, 32], strides = [1, 1]} : vector<8x64xf32> to vector<8x32xf32>
      %37 = vector.shape_cast %36 : vector<8x32xf32> to vector<8x4x8xf32>
      %38 = tpu.transpose %37, [1, 0, 2] : vector<8x4x8xf32> -> vector<4x8x8xf32>
      %39 = vector.extract_strided_slice %35 {offsets = [0, 32], sizes = [8, 32], strides = [1, 1]} : vector<8x64xf32> to vector<8x32xf32>
      %40 = vector.shape_cast %39 : vector<8x32xf32> to vector<8x4x8xf32>
      %41 = tpu.transpose %40, [1, 0, 2] : vector<8x4x8xf32> -> vector<4x8x8xf32>
      %c0_28 = arith.constant 0 : index
      %c0_29 = arith.constant 0 : index
      %c0_30 = arith.constant 0 : index
      %42 = vector.load %arg8[%c0_28, %c0_29, %c0_30] : memref<4x8x8xf32, #tpu.memory_space<vmem>>, vector<4x8x8xf32>
      tpu.vector_store %arg8[%c0_28, %c0_29, %c0_30], %38 {strides = array<i32>} : memref<4x8x8xf32, #tpu.memory_space<vmem>>, vector<4x8x8xf32>,
      %c0_31 = arith.constant 0 : index
      %c0_32 = arith.constant 0 : index
      %c0_33 = arith.constant 0 : index
      %43 = vector.load %arg9[%c0_31, %c0_32, %c0_33] : memref<4x8x8xf32, #tpu.memory_space<vmem>>, vector<4x8x8xf32>
      tpu.vector_store %arg9[%c0_31, %c0_32, %c0_33], %41 {strides = array<i32>} : memref<4x8x8xf32, #tpu.memory_space<vmem>>, vector<4x8x8xf32>,
    } else {
    }
    %c0 = arith.constant 0 : index
    %c0_1 = arith.constant 0 : index
    %c0_2 = arith.constant 0 : index
    %3 = vector.load %arg2[%c0, %c0_1, %c0_2] : memref<1x8x32xf32, #tpu.memory_space<vmem>>, vector<1x8x32xf32>
    %4 = vector.shape_cast %3 : vector<1x8x32xf32> to vector<8x32xf32>
    %c0_3 = arith.constant 0 : index
    %c0_4 = arith.constant 0 : index
    %5 = vector.load %arg4[%c0_3, %c0_4] : memref<32x32xf32, #tpu.memory_space<vmem>>, vector<32x32xf32>
    %cst = arith.constant dense<0.000000e+00> : vector<8x32xf32>
    %6 = tpu.matmul %4, %5, %cst {dimension_numbers = #tpu.dot_dimension_numbers<[1], [0], [0], [1], [0, 0, 1, 1], [], []>} : vector<8x32xf32>, vector<32x32xf32>, vector<8x32xf32> -> vector<8x32xf32>
    %cst_5 = arith.constant 0.176776692 : f32
    %7 = vector.broadcast %cst_5 : f32 to vector<8x32xf32>
    %8 = arith.mulf %6, %7 : vector<8x32xf32>
    %9 = vector.shape_cast %8 : vector<8x32xf32> to vector<8x4x8xf32>
    %10 = tpu.transpose %9, [1, 0, 2] : vector<8x4x8xf32> -> vector<4x8x8xf32>
    %c0_6 = arith.constant 0 : index
    %c0_7 = arith.constant 0 : index
    %c0_8 = arith.constant 0 : index
    %11 = vector.load %arg8[%c0_6, %c0_7, %c0_8] : memref<4x8x8xf32, #tpu.memory_space<vmem>>, vector<4x8x8xf32>
    %c0_9 = arith.constant 0 : index
    %c0_10 = arith.constant 0 : index
    %c0_11 = arith.constant 0 : index
    %12 = vector.load %arg9[%c0_9, %c0_10, %c0_11] : memref<4x8x8xf32, #tpu.memory_space<vmem>>, vector<4x8x8xf32>
    "tpu.trace_start"() <{level = 10 : i32, message = "hqa,hka->hqk"}> : () -> ()
    %cst_12 = arith.constant dense<0.000000e+00> : vector<4x8x8xf32>
    %13 = tpu.matmul %10, %11, %cst_12 {dimension_numbers = #tpu.dot_dimension_numbers<[2], [2], [1], [1], [0, 0, 0, 1, 1, 1], [0], [0]>} : vector<4x8x8xf32>, vector<4x8x8xf32>, vector<4x8x8xf32> -> vector<4x8x8xf32>
    "tpu.trace_stop"() : () -> ()
    %cst_13 = arith.constant dense<0xFF800000> : vector<4x8xf32>
    %14 = vector.multi_reduction <maximumf>, %13, %cst_13 [2] : vector<4x8x8xf32> to vector<4x8xf32>
    %15 = vector.shape_cast %14 : vector<4x8xf32> to vector<4x8x1xf32>
    %16 = vector.broadcast %15 : vector<4x8x1xf32> to vector<4x8x8xf32>
    %17 = arith.subf %13, %16 : vector<4x8x8xf32>
    %18 = math.exp %17 : vector<4x8x8xf32>
    %cst_14 = arith.constant dense<0.000000e+00> : vector<4x8xf32>
    %19 = vector.multi_reduction <add>, %18, %cst_14 [2] : vector<4x8x8xf32> to vector<4x8xf32>
    %20 = vector.shape_cast %19 : vector<4x8xf32> to vector<4x8x1xf32>
    "tpu.trace_start"() <{level = 10 : i32, message = "hqk,hka->hqa"}> : () -> ()
    %cst_15 = arith.constant dense<0.000000e+00> : vector<4x8x8xf32>
    %21 = tpu.matmul %18, %12, %cst_15 {dimension_numbers = #tpu.dot_dimension_numbers<[2], [1], [1], [2], [0, 0, 0, 1, 1, 2], [0], [0]>} : vector<4x8x8xf32>, vector<4x8x8xf32>, vector<4x8x8xf32> -> vector<4x8x8xf32>
    "tpu.trace_stop"() : () -> ()
    %22 = tpu.reciprocal %20 : vector<4x8x1xf32> -> vector<4x8x1xf32>
    %23 = vector.broadcast %22 : vector<4x8x1xf32> to vector<4x8x8xf32>
    %24 = arith.mulf %21, %23 : vector<4x8x8xf32>
    %25 = tpu.transpose %24, [1, 0, 2] : vector<4x8x8xf32> -> vector<8x4x8xf32>
    %26 = vector.shape_cast %25 : vector<8x4x8xf32> to vector<8x32xf32>
    %c0_16 = arith.constant 0 : index
    %c0_17 = arith.constant 0 : index
    %27 = vector.load %arg6[%c0_16, %c0_17] : memref<32x32xf32, #tpu.memory_space<vmem>>, vector<32x32xf32>
    %cst_18 = arith.constant dense<0.000000e+00> : vector<8x32xf32>
    %28 = tpu.matmul %26, %27, %cst_18 {dimension_numbers = #tpu.dot_dimension_numbers<[1], [0], [0], [1], [0, 0, 1, 1], [], []>} : vector<8x32xf32>, vector<32x32xf32>, vector<8x32xf32> -> vector<8x32xf32>
    %c0_19 = arith.constant 0 : index
    %c0_20 = arith.constant 0 : index
    %c0_21 = arith.constant 0 : index
    %29 = vector.load %arg7[%c0_19, %c0_20, %c0_21] : memref<1x8x32xf32, #tpu.memory_space<vmem>>, vector<1x8x32xf32>
    %30 = vector.shape_cast %29 : vector<1x8x32xf32> to vector<8x32xf32>
    %31 = vector.shape_cast %28 : vector<8x32xf32> to vector<1x8x32xf32>
    tpu.vector_store %arg7[%c0_19, %c0_20, %c0_21], %31 {strides = array<i32>} : memref<1x8x32xf32, #tpu.memory_space<vmem>>, vector<1x8x32xf32>,
    return
  }
  func.func @transform_0(%arg0: i32, %arg1: i32) -> (i32, i32, i32) {
    %c0_i32 = arith.constant 0 : i32
    %c0_i32_0 = arith.constant 0 : i32
    return %arg0, %arg1, %c0_i32 : i32, i32, i32
  }
  func.func @transform_1(%arg0: i32, %arg1: i32) -> (i32, i32, i32) {
    %c0_i32 = arith.constant 0 : i32
    %c0_i32_0 = arith.constant 0 : i32
    %c0_i32_1 = arith.constant 0 : i32
    return %arg0, %c0_i32, %c0_i32_0 : i32, i32, i32
  }
  func.func @transform_2(%arg0: i32, %arg1: i32) -> (i32, i32) {
    %c0_i32 = arith.constant 0 : i32
    %c0_i32_0 = arith.constant 0 : i32
    %c0_i32_1 = arith.constant 0 : i32
    return %c0_i32, %c0_i32_0 : i32, i32
  }
  func.func @transform_3(%arg0: i32, %arg1: i32) -> (i32, i32) {
    %c0_i32 = arith.constant 0 : i32
    %c0_i32_0 = arith.constant 0 : i32
    %c0_i32_1 = arith.constant 0 : i32
    return %c0_i32, %c0_i32_0 : i32, i32
  }
  func.func @transform_4(%arg0: i32, %arg1: i32) -> (i32, i32) {
    %c0_i32 = arith.constant 0 : i32
    %c0_i32_0 = arith.constant 0 : i32
    %c0_i32_1 = arith.constant 0 : i32
    return %c0_i32, %c0_i32_0 : i32, i32
  }
  func.func @transform_5(%arg0: i32, %arg1: i32) -> (i32, i32, i32) {
    %c0_i32 = arith.constant 0 : i32
    %c0_i32_0 = arith.constant 0 : i32
    return %arg0, %arg1, %c0_i32 : i32, i32, i32
  }
}

</mosaic_0001>

<bundles_post_ra>
// kernel: tpu_custom_call.1
= control target key start
LH: loop header
LB: loop body
LE: loop exit
PB: predicated region body
PF: predicated region fallthrough
CT: control target
= control target key end

     0   :  { %s2874_s0 = inlined_call_operand.hbm [shape: f32[2,8,32], index: 0, kind: input, shape index: {}]   ;;  %s2875_s1 = inlined_call_operand.hbm [shape: f32[2,8,32], index: 1, kind: input, shape index: {}]   ;;  %s2876_s2 = inlined_call_operand.hbm [shape: f32[32,32], index: 2, kind: input, shape index: {}]   ;;  %s2877_s3 = inlined_call_operand.hbm [shape: f32[32,64], index: 3, kind: input, shape index: {}]   ;;  %s2878_s4 = inlined_call_operand.hbm [shape: f32[32,32], index: 4, kind: input, shape index: {}]   ;;  %s2879_s5 = inlined_call_operand.hbm [shape: f32[2,8,32], index: 5, kind: output, shape index: {}]  }
   0x1   :  { %2887 = sst [smem:[#allocation19_spill]] %s2875_s1 }
   0x2   :  { %10 = vsyncpa [#allocation5], 0 }
   0x3   :  { %12 = vsyncpa [#allocation5 + $0x1], 0 }
   0x4   :  { %13 = vsyncpa [#allocation8], 0 }
   0x5   :  { %14 = vsyncpa [#allocation11], 0 }
   0x6   :  { %15 = vsyncpa [#allocation6], 0 }
   0x7   :  { %17 = vsyncpa [#allocation6 + $0x1], 0  ;;  %s2499_s18 = smov 0   ;;  %s2501_s19 = smov 0  }
   0x8   :  { %s2503_s20 = smov 0   ;;  %s2505_s21 = smov 0  }
   0x9   :  { %s2507_s22 = smov 0   ;;  %s2509_s23 = smov 0  }
   0xa LB: > { %s1947_s24 = sadd.s32 4294967295, %s2448_s23   ;;  %s1948_s25 = sadd.s32 4294967294, %s2448_s23   ;;  %s2448_s23 = sphi %s2509_s23, %s23_s23   ;;  %s2444_s22 = sphi %s2507_s22, %s2910_s22   ;;  %s2440_s21 = sphi %s2505_s21, %s2909_s21   ;;  %s2436_s20 = sphi %s2503_s20, %s2908_s20   ;;  %s2432_s19 = sphi %s2501_s19, %s2907_s19   ;;  %s2428_s18 = sphi %s2499_s18, %s2906_s18  }
   0xb   : > { %p57_p0 = scmp.ne.s32.totalorder %s2432_s19, %s2428_s18  ;;  %p2533_p1 = scmp.eq.s32.totalorder %s1947_s24, 0 }
   0xc   : > { %p2537_p2 = scmp.eq.s32.totalorder %s1947_s24, 1  ;;  %p178_p3 = scmp.eq.s32.totalorder %s1948_s25, 1 }
   0xd   : > { %s2888_s26 = scalar_select %p2533_p1, 1, 0 }
   0xe   : > { %s2889_s27 = scalar_select %p2537_p2, 1, 0 }
   0xf   : > { %p2543_p4 = por %p2533_p1, %p57_p0  ;;  %p1949_p5 = scmp.ge.s32.totalorder %s2448_s23, 1 }
  0x10   : > { %p2548_p6 = por %p178_p3, %p57_p0  ;;  %p185_p7 = scmp.lt.s32.totalorder %s2448_s23, 3 }
  0x11   : > { %s2890_s28 = scalar_select %p2543_p4, 1, 0 }
  0x12   : > { %s2891_s29 = scalar_select %p2548_p6, 1, 0 }
  0x13   : > { %s2886_s30 = sshll.u32 %s2440_s21, 7  ;;  %p2554_p8 = pnand %p1949_p5, %p185_p7 }
  0x14   : > { %s2893_s1 = sld [smem:[#allocation19_spill]]  ;;  %s2450_s10 = smov [#allocation7]  }
  0x15   : > { %s2892_s6 = scalar_select %p2554_p8, 1, 0 }
  0x16   : > { %s200_s11 = sshll.u32 %s2450_s10, 4  ;;  %p2112_p9 = pneg %p2554_p8  ;;  %s201_s11 = int_to_ptr.vmem [resolvable:$true] %s200_s11 }
  0x18   : > { %p2568_p11 = pnand %p2112_p9, %p2543_p4  ;;  %p2574_p12 = pnand %p2112_p9, %p2533_p1 }
  0x1a   : > { %s198_s9 = scalar_lea.hbm %s2893_s1, %s2886_s30  ;;  %p2224_p0 = pneg %p2568_p11 }
  0x1b   : > { %s2895_s13 = scalar_select %p2574_p12, 1, 0 }
  0x1c   : > { %s2222_s14 = scalar_lea.hbm %s198_s9, 128  ;;  %s2227_s17 = scalar_lea.hbm %s2893_s1, 256 }
  0x1d   : > { %p2223_p13 = scmp.ne.s32.totalorder %s198_s9, %s2222_s14  ;;  %p2228_p7 = scmp.lt.s32.totalorder %s198_s9, %s2893_s1 }
  0x1e   : > { %p2229_p10 = scmp.lt.s32.totalorder %s2227_s17, %s2222_s14 }
  0x1f   : > { %p2225_p3 = pnand %p2224_p0, %p2223_p13 }
  0x20   : > { %p2230_p6 = por %p2229_p10, %p2228_p7 }
  0x21   : > { %p2226_p5 = pneg %p2225_p3 }
  0x23   : > { %p2231_p9 = pnand %p2230_p6, %p2226_p5 }
  0x25   : > { %2234 = shalt.err (!%p2231_p9)
}
  0x26   : > { %s2235_s7 = scalar_lea.vmem %s201_s11, 128  ;;  %p2243_p2 = scmp.lt.s32.totalorder %s201_s11, %s201_s11 }
  0x27   : > { %p2236_p1 = scmp.ne.s32.totalorder %s201_s11, %s2235_s7  ;;  %p2244_p12 = scmp.lt.s32.totalorder %s2235_s7, %s2235_s7 }
  0x29   : > { %p2238_p4 = pnand %p2236_p1, %p2224_p0  ;;  %p2245_p13 = por %p2244_p12, %p2243_p2 }
  0x2b   : > { %p2239_p8 = pneg %p2238_p4 }
  0x2d   : > { %p2246_p3 = pnand %p2245_p13, %p2239_p8 }
  0x2f   : > { %2249 = shalt.err (!%p2246_p3)
}
  0x30   : > { %2115 = dma.hbm_to_vmem [thread:$0]  (!%p2568_p11), %s198_s9, 128, %s201_s11, [#allocation8]  }
  0x31   : > { %s2451_s8 = smov [#allocation10]   ;;  %s2452_s14 = smov [#allocation9]  }
  0x32   : > { %s223_s10 = sshll.u32 %s2451_s8, 4  ;;  %s210_s15 = sshll.u32 %s2452_s14, 4  ;;  %s224_s10 = int_to_ptr.vmem [resolvable:$true] %s223_s10  ;;  %s211_s15 = int_to_ptr.vmem [resolvable:$true] %s210_s15 }
  0x33   : > { %p2896_p6 = scmp.ne.s32.totalorder %s2895_s13, 0  ;;  %s2261_s16 = scalar_lea.vmem %s224_s10, 512 }
  0x34   : > { %p2262_p1 = scmp.ne.s32.totalorder %s224_s10, %s2261_s16  ;;  %p2269_p8 = scmp.lt.s32.totalorder %s224_s10, %s224_s10 }
  0x35   : > { %p2252_p10 = pneg %p2896_p6  ;;  %p2270_p12 = scmp.lt.s32.totalorder %s2261_s16, %s2261_s16 }
  0x37   : > { %p2264_p4 = pnand %p2262_p1, %p2252_p10  ;;  %p2271_p0 = por %p2270_p12, %p2269_p8 }
  0x39   : > { %p2265_p2 = pneg %p2264_p4 }
  0x3b   : > { %p2272_p5 = pnand %p2271_p0, %p2265_p2 }
  0x3d   : > { %2275 = shalt.err (!%p2272_p5)
}
  0x3e   : > { %s2453_s12 = smov 128   ;;  %s2454_s9 = smov 8  }
  0x3f   : > { %2121 = dma.hbm_to_vmem [thread:$0]  (!%p2896_p6), %s2877_s3, 512, %s224_s10, [#allocation11], %s2453_s12, %s2453_s12, %s2454_s9  }
  0x40   : > { %s2287_s24 = scalar_lea.vmem %s211_s15, 512  ;;  %p2295_p13 = scmp.lt.s32.totalorder %s211_s15, %s211_s15 }
  0x41   : > { %p2288_p11 = scmp.ne.s32.totalorder %s211_s15, %s2287_s24  ;;  %p2296_p3 = scmp.lt.s32.totalorder %s2287_s24, %s2287_s24 }
  0x43   : > { %p2290_p7 = pnand %p2288_p11, %p2252_p10  ;;  %p2297_p1 = por %p2296_p3, %p2295_p13 }
  0x45   : > { %p2291_p9 = pneg %p2290_p7 }
  0x47   : > { %p2298_p4 = pnand %p2297_p1, %p2291_p9 }
  0x49   : > { %2301 = shalt.err (!%p2298_p4)
}
  0x4a   : > { %2118 = dma.hbm_to_vmem [thread:$0]  (!%p2896_p6), %s2876_s2, 512, %s211_s15, [#allocation8], %s2453_s12, %s2453_s12, %s2454_s9  }
  0x4b   : > { %s2455_s8 = smov [#allocation12]  }
  0x4c   : > { %s236_s10 = sshll.u32 %s2455_s8, 4  ;;  %s237_s10 = int_to_ptr.vmem [resolvable:$true] %s236_s10 }
  0x4d   : > { %s2313_s14 = scalar_lea.vmem %s237_s10, 512  ;;  %p2321_p0 = scmp.lt.s32.totalorder %s237_s10, %s237_s10 }
  0x4e   : > { %p2314_p2 = scmp.ne.s32.totalorder %s237_s10, %s2313_s14  ;;  %p2322_p5 = scmp.lt.s32.totalorder %s2313_s14, %s2313_s14 }
  0x50   : > { %p2316_p8 = pnand %p2314_p2, %p2252_p10  ;;  %p2323_p11 = por %p2322_p5, %p2321_p0 }
  0x52   : > { %p2317_p12 = pneg %p2316_p8 }
  0x54   : > { %p2324_p7 = pnand %p2323_p11, %p2317_p12 }
  0x56   : > { %2327 = shalt.err (!%p2324_p7)
}
  0x57   : > { %2124 = dma.hbm_to_vmem [thread:$0]  (!%p2896_p6), %s2878_s4, 512, %s237_s10, [#allocation11], %s2453_s12, %s2453_s12, %s2454_s9  }
  0x58   : > { %s35_s15 = sadd.s32 1, %s2444_s22  ;;  %s44_s17 = sadd.s32 1, %s2436_s20 }
  0x59   : > { %p37_p10 = scmp.ge.s32.totalorder %s35_s15, 2  ;;  %p51_p9 = scmp.ne.s32.totalorder %s2436_s20, %s2432_s19 }
  0x5a   : > { %p52_p13 = scmp.eq.s32.totalorder %s2448_s23, 0  ;;  %p2136_p3 = scmp.lt.s32.totalorder %s2448_s23, 2 }
  0x5b   : > { %s2912_s15 = smov (%p37_p10, %s35_s15), 0  ;;  %p2897_p4 = scmp.ne.s32.totalorder %s2889_s27, 0 }
  0x5c   : > { %p53_p1 = por %p52_p13, %p51_p9  ;;  %s39_s24 = ssub.s32 %s2444_s22, %s2912_s15 }
  0x5d   : > { %p2624_p2 = por %p2897_p4, %p51_p9  ;;  %s250_s25 = sand.u32 1, %s2436_s20  }
  0x5e   : > { %p42_p8 = scmp.eq.s32.totalorder %s39_s24, 0  ;;  %s1955_s12 = sshll.u32 %s250_s25, 3 }
  0x5f   : > { %s1956_s9 = sshll.u32 %s2444_s22, 7  ;;  %s254_s16 = scalar_lea.vmem [#allocation4], %s1955_s12 }
  0x60   : > { %s2633_s7 = scalar_select %p42_p8, %s2436_s20, %s44_s17  }
  0x61   : > { %s260_s14 = scalar_lea.hbm %s2874_s0, %s1956_s9  ;;  %s262_s11 = sshll.u32 %s254_s16, 4  ;;  %s263_s11 = int_to_ptr.vmem [resolvable:$true] %s262_s11 }
  0x62   : > { %p2640_p6 = pnand %p2136_p3, %p53_p1  ;;  %s251_s30 = scalar_lea.sflag [#allocation5], %s250_s25 }
  0x63   : > { %s2341_s24 = scalar_lea.vmem %s263_s11, 128  ;;  %s2456_s17 = smov [#allocation4]  }
  0x64   : > { %p2330_p12 = pneg %p2640_p6  ;;  %p2342_p0 = scmp.ne.s32.totalorder %s263_s11, %s2341_s24 }
  0x65   : > { %s2346_s1 = sshll.u32 %s2456_s17, 4  ;;  %s2347_s1 = int_to_ptr.vmem [resolvable:$false] %s2346_s1 }
  0x66   : > { %p2344_p5 = pnand %p2342_p0, %p2330_p12  ;;  %s2348_s9 = scalar_lea.vmem %s2347_s1, 256 }
  0x67   : > { %p2349_p7 = scmp.lt.s32.totalorder %s263_s11, %s2347_s1  ;;  %p2350_p10 = scmp.lt.s32.totalorder %s2348_s9, %s2341_s24 }
  0x68   : > { %p2345_p11 = pneg %p2344_p5 }
  0x69   : > { %p2351_p9 = por %p2350_p10, %p2349_p7 }
  0x6b   : > { %p2352_p13 = pnand %p2351_p9, %p2345_p11 }
  0x6d   : > { %2355 = shalt.err (!%p2352_p13)
}
  0x6e   : > { %2128 = dma.hbm_to_vmem [thread:$0]  (!%p2640_p6), %s260_s14, 128, %s263_s11, %s251_s30  }
  0x6f   : > { %p2900_p3 = scmp.ne.s32.totalorder %s2892_s6, 0 }
  0x70   : > { %s2651_s25 = sand.u32 (!%p2900_p3), 1, %s2432_s19   ;;  %p2901_p1 = scmp.ne.s32.totalorder (!%p2900_p3), %s2890_s28, 0 }
  0x71   : > { %271 = sbr.rel (%p2900_p3) target bundleno = 1375 (0x55f), region = 40  ;;  %s1958_s12 = sshll.u32 (!%p2900_p3), %s2651_s25, 3 }
  0x72   : > { %s274_s8 = scalar_lea.sflag (!%p2900_p3), [#allocation5], %s2651_s25  ;;  %s2657_s1 = scalar_lea.vmem (!%p2900_p3), [#allocation4], %s1958_s12 }
  0x76   : > { %2407 = dma.done.wait (%p2901_p1), %s274_s8, 128  }
  0x77   : > { %2409 = vsyncadd (%p2901_p1), %s274_s8, 4294967168 }
  0x78   : > { %2411 = dma.done.wait (%p2901_p1), [#allocation8], 128  }
  0x79   : > { %2413 = vsyncadd (%p2901_p1), [#allocation8], 4294967168  ;;  %p2902_p4 = scmp.ne.s32.totalorder %s2888_s26, 0 }
  0x7b   : > { %2415 = dma.done.wait (%p2902_p4), [#allocation8], 512  }
  0x7c   : > { %2417 = vsyncadd (%p2902_p4), [#allocation8], 4294966784 }
  0x7d   : > { %2419 = dma.done.wait (%p2902_p4), [#allocation11], 1024  }
  0x7e   : > { %2421 = vsyncadd (%p2902_p4), [#allocation11], 4294966272  ;;  %v2457_v0 = vmov 0.0   ;;  %vm2458_vm0 = vmmov 0   ;;  %v328_v1 = vld [vmem:[#allocation10 + $0x18] sm:$0xff]  ;;  %v327_v2 = vld [vmem:[#allocation10 + $0x10] sm:$0xff]  ;;  %v418_v18 = vlaneseq }
  0x7f   : > { %2021 = vmatprep.subr.mxu0 %v2457_v0  ;;  %2032 = vmatprep.subr.mxu1 %v2457_v0  ;;  %v710_v3 = vld [vmem:[#allocation9 + $0x18] sm:$0xff]  ;;  %v709_v4 = vld [vmem:[#allocation9 + $0x10] sm:$0xff]  ;;  %v326_v5 = vld [vmem:[#allocation10 + $0x8] sm:$0xff]  ;;  %vm329_vm1 = vcmask 261120   ;;  %s2459_s26 = smov 104   ;;  %s2460_s28 = smov 120  }
  0x80   : > { %2029 = vmatprep.mubr.msk.f32.mxu0 %vm2458_vm0, %v2457_v0  ;;  %2040 = vmatprep.mubr.msk.f32.mxu1 %vm2458_vm0, %v2457_v0  ;;  %v708_v6 = vld [vmem:[#allocation9 + $0x8] sm:$0xff]  ;;  %v325_v7 = vld [vmem:[#allocation10] sm:$0xff]  ;;  %v324_v9 = vld [vmem:[#allocation7] sm:$0xff]  ;;  %s2461_s30 = smov 112   ;;  %s2462_s6 = smov 96   ;;  %v419_v22 = vshrl.u32 %v418_v18, 7 }
  0x81   : > { %2022 = vmatpush3.msra.mxu0 %v328_v1  ;;  %2033 = vmatpush3.msra.mxu1 %v710_v3  ;;  %v707_v8 = vld [vmem:[#allocation9] sm:$0xff]  ;;  %v706_v10 = vld [vmem:[%s2657_s1] sm:$0xff]  ;;  %v2463_v16 = vmov 1983009808   ;;  %v2464_v19 = vmov 1934713408  }
  0x82   : > { %2023 = vmatprep.subr.mxu0 %v2457_v0  ;;  %2034 = vmatprep.subr.mxu1 %v2457_v0  ;;  %v416_v17 = vunpack.c.l.s4 %v2463_v16  ;;  %v448_v20 = vunpack.c.l.s4 %v2464_v19  ;;  %vm697_vm2 = vcmask 64512   ;;  %s2465_s10 = smov 16   ;;  %s2466_s14 = smov 8   ;;  %vm1730_vm3 = vcmask 130048  }
  0x83   : > { %2024 = vmatpush3.msra.mxu0 %v327_v2  ;;  %2035 = vmatpush3.msra.mxu1 %v709_v4  ;;  %s2467_s16 = smov 24   ;;  %vm1732_vm4 = vcmask 195584   ;;  %s319_s11 = scalar_lea.vmem [#allocation13], %s1958_s12 }
  0x84   : > { %2025 = vmatprep.subr.mxu0 %v2457_v0  ;;  %2036 = vmatprep.subr.mxu1 %v2457_v0  ;;  %v417_v21 = vunpack.c.0.s8 %v416_v17  ;;  %v449_v25 = vunpack.c.0.s8 %v448_v20  ;;  %s1827_s27 = sshll.u32 %s319_s11, 4  ;;  %s2903_s24 = sshll.u32 %s2440_s21, 7  ;;  %s2827_s27 = int_to_ptr.vmem [resolvable:$true] %s1827_s27 }
  0x85   : > { %2026 = vmatpush3.msra.mxu0 %v326_v5  ;;  %2037 = vmatpush3.msra.mxu1 %v708_v6  ;;  %s2825_s8 = scalar_lea.hbm %s2879_s5, %s2903_s24  ;;  %s1813_s1 = scalar_lea.sflag [#allocation6], %s2651_s25 }
  0x86   : > { %2027 = vmatprep.subr.mxu0 %v2457_v0  ;;  %2038 = vmatprep.subr.mxu1 %v2457_v0  ;;  %v2696_v26 = vsub.s32 %v417_v21, %v419_v22  ;;  %v2698_v33 = vsub.s32 %v449_v25, %v419_v22  ;;  %s2468_s21 = smov [#allocation13]  }
  0x87   : > { %2028 = vmatpush3.msra.mxu0 %v325_v7  ;;  %2039 = vmatpush3.msra.mxu1 %v707_v8  ;;  %s2360_s12 = sshll.u32 %s2468_s21, 4  ;;  %s2361_s12 = int_to_ptr.vmem [resolvable:$false] %s2360_s12 }
  0x88   : > { %2030 = vmatmul.mubr.msk.f32.vlgmr.msra.gmra.mxu0 %vm329_vm1, %v324_v9  ;;  %2041 = vmatmul.mubr.msk.f32.vlgmr.msra.gmra.mxu1 %vm329_vm1, %v706_v10  ;;  %p2363_p0 = scmp.lt.s32.totalorder %s2827_s27, %s2361_s12 }
  0x89   : > { %2043 = vmatprep.subr.mxu1 %v2457_v0  ;;  %2053 = vmatprep.subr.mxu0 %v2457_v0 }
  0x8a   : > { %2045 = vmatprep.mubr.msk.f32.mxu1 %vm2458_vm0, %v2457_v0  ;;  %2055 = vmatprep.mubr.msk.f32.mxu0 %vm2458_vm0, %v2457_v0 }
 0x148   : > { %v399_v11 = vpop.f32.mrf.mxu0  ;;  %v781_v12 = vpop.f32.mrf.mxu1 }
 0x149   : > { %410 = vrot.lane.b32.xlu1 %v399_v11, %s2459_s26  ;;  %404 = vrot.lane.b32.xlu0 %v399_v11, %s2460_s28  ;;  %v785_v13 = vmul.f32 0.17677669, %v781_v12 }
 0x14a   : > { %v2031_v14 = vpop.f32.mrf.mxu0  ;;  %v2042_v15 = vpop.f32.mrf.mxu1 }
 0x14d   : > { %787 = vrot.lane.b32.xlu1 %v785_v13, %s2460_s28  ;;  %407 = vrot.lane.b32.xlu0 %v399_v11, %s2461_s30  ;;  %s2362_s28 = scalar_lea.vmem %s2361_s12, 256 }
 0x151   : > { %793 = vrot.lane.b32.xlu1 %v785_v13, %s2459_s26  ;;  %790 = vrot.lane.b32.xlu0 %v785_v13, %s2461_s30  ;;  %s2356_s26 = scalar_lea.vmem %s2827_s27, 128 }
 0x152   : > { %p2357_p8 = scmp.ne.s32.totalorder %s2827_s27, %s2356_s26  ;;  %p2364_p5 = scmp.lt.s32.totalorder %s2362_s28, %s2356_s26 }
 0x154   : > { %p2358_p6 = pnand %p2357_p8, %p2624_p2  ;;  %p2365_p11 = por %p2364_p5, %p2363_p0 }
 0x155   : > { %549 = vrot.lane.b32.xlu0 %v399_v11, %s2462_s6 }
 0x156   : > { %p2359_p12 = pneg %p2358_p6 }
 0x158   : > { %p2366_p7 = pnand %p2365_p11, %p2359_p12 }
 0x1bb   : > { %v411_v23 = vpop.permute.xlu1 %410  ;;  %v405_v24 = vpop.permute.xlu0 %404 }
 0x1bc   : > { %551 = vrot.lane.b32.xlu1 %v405_v24, %s2462_s6  ;;  %v429_v27 = vcombine.low %v405_v24, %v411_v23  ;;  %v430_v28 = vcombine.high %v405_v24, %v411_v23 }
 0x1be   : > { %v437_v34 = vrot.slane %v429_v27, %v2696_v26  ;;  %v444_v35 = vrot.slane %v430_v28, %v2696_v26 }
 0x1bf   : > { %v788_v29 = vpop.permute.xlu1 %787  ;;  %v408_v30 = vpop.permute.xlu0 %407 }
 0x1c0   : > { %v413_v31 = vcombine.low %v399_v11, %v408_v30  ;;  %v414_v32 = vcombine.high %v399_v11, %v408_v30  ;;  %555 = vrot.lane.b32.xlu1 %v411_v23, %s2462_s6  ;;  %553 = vrot.lane.b32.xlu0 %v408_v30, %s2462_s6 }
 0x1c2   : > { %v421_v36 = vrot.slane %v413_v31, %v2696_v26  ;;  %v428_v37 = vrot.slane %v414_v32, %v2696_v26 }
 0x1c3   : > { %v794_v38 = vpop.permute.xlu1 %793  ;;  %v791_v39 = vpop.permute.xlu0 %790 }
 0x1c4   : > { %v445_v40 = vcombine.low %v421_v36, %v437_v34  ;;  %v446_v41 = vcombine.high %v421_v36, %v437_v34  ;;  %v461_v42 = vcombine.low %v428_v37, %v444_v35  ;;  %v462_v43 = vcombine.high %v428_v37, %v444_v35 }
 0x1c5   : > { %v812_v44 = vcombine.low %v788_v29, %v794_v38  ;;  %v813_v45 = vcombine.high %v788_v29, %v794_v38  ;;  %v796_v46 = vcombine.low %v785_v13, %v791_v39  ;;  %v797_v47 = vcombine.high %v785_v13, %v791_v39 }
 0x1c6   : > { %v453_v48 = vrot.slane %v445_v40, %v2698_v33  ;;  %v460_v49 = vrot.slane %v446_v41, %v2698_v33  ;;  %v469_v50 = vrot.slane %v461_v42, %v2698_v33  ;;  %v476_v51 = vrot.slane %v462_v43, %v2698_v33 }
 0x1c7   : > { %v820_v52 = vrot.slane %v812_v44, %v2696_v26  ;;  %v827_v53 = vrot.slane %v813_v45, %v2696_v26  ;;  %v804_v54 = vrot.slane %v796_v46, %v2696_v26  ;;  %v811_v55 = vrot.slane %v797_v47, %v2696_v26  ;;  %v550_v47 = vpop.permute.xlu0 %549 }
 0x1c8   : > { %v481_v56 = vcombine.low %v453_v48, %v460_v49  ;;  %v1964_v57 = vcombine.high %v453_v48, %v460_v49  ;;  %v497_v58 = vcombine.low %v469_v50, %v476_v51  ;;  %v1965_v59 = vcombine.high %v469_v50, %v476_v51 }
 0x1c9   : > { %v828_v60 = vcombine.low %v804_v54, %v820_v52  ;;  %v829_v61 = vcombine.high %v804_v54, %v820_v52  ;;  %v844_v62 = vcombine.low %v811_v55, %v827_v53  ;;  %v845_v63 = vcombine.high %v811_v55, %v827_v53 }
 0x1ca   : > { %v488_v1 = vrot.slane %v481_v56, %v2696_v26  ;;  %v496_v2 = vrot.slane %v1964_v57, %v2696_v26  ;;  %v504_v3 = vrot.slane %v497_v58, %v2696_v26  ;;  %v512_v4 = vrot.slane %v1965_v59, %v2696_v26 }
 0x1cb   : > { %v836_v5 = vrot.slane %v828_v60, %v2698_v33  ;;  %v843_v6 = vrot.slane %v829_v61, %v2698_v33  ;;  %v852_v7 = vrot.slane %v844_v62, %v2698_v33  ;;  %v859_v8 = vrot.slane %v845_v63, %v2698_v33 }
 0x1cc   : > { %v513_v9 = vcombine.low %v488_v1, %v496_v2  ;;  %v514_v10 = vcombine.high %v488_v1, %v496_v2  ;;  %v529_v11 = vcombine.low %v504_v3, %v512_v4  ;;  %v530_v12 = vcombine.high %v504_v3, %v512_v4 }
 0x1cd   : > { %v864_v13 = vcombine.low %v836_v5, %v843_v6  ;;  %v1969_v14 = vcombine.high %v836_v5, %v843_v6  ;;  %v880_v15 = vcombine.low %v852_v7, %v859_v8  ;;  %v1970_v16 = vcombine.high %v852_v7, %v859_v8 }
 0x1ce   : > { %v521_v17 = vrot.slane %v513_v9, %v2698_v33  ;;  %v528_v18 = vrot.slane %v514_v10, %v2698_v33  ;;  %v537_v19 = vrot.slane %v529_v11, %v2698_v33  ;;  %v544_v20 = vrot.slane %v530_v12, %v2698_v33 }
 0x1cf   : > { %v871_v21 = vrot.slane %v864_v13, %v2696_v26  ;;  %v879_v22 = vrot.slane %v1969_v14, %v2696_v26  ;;  %v887_v23 = vrot.slane %v880_v15, %v2696_v26  ;;  %v895_v24 = vrot.slane %v1970_v16, %v2696_v26 }
 0x1d0   : > { %v545_v25 = vcombine.low %v521_v17, %v537_v19  ;;  %v546_v27 = vcombine.high %v521_v17, %v537_v19  ;;  %v547_v28 = vcombine.low %v528_v18, %v544_v20  ;;  %v548_v29 = vcombine.high %v528_v18, %v544_v20 }
 0x1d1   : > { %v896_v30 = vcombine.low %v871_v21, %v879_v22  ;;  %v897_v31 = vcombine.high %v871_v21, %v879_v22  ;;  %v912_v32 = vcombine.low %v887_v23, %v895_v24  ;;  %v913_v34 = vcombine.high %v887_v23, %v895_v24 }
 0x1d2   : > { %698 = vst.msk [vmem:[#allocation2] sm:$0xff] %vm697_vm2, %v545_v25  ;;  %699 = vst.msk [vmem:[#allocation2 + $0x8] sm:$0xff] %vm697_vm2, %v546_v27 }
 0x1d3   : > { %700 = vst.msk [vmem:[#allocation2 + $0x10] sm:$0xff] %vm697_vm2, %v547_v28  ;;  %701 = vst.msk [vmem:[#allocation2 + $0x18] sm:$0xff] %vm697_vm2, %v548_v29  ;;  %v904_v35 = vrot.slane %v896_v30, %v2698_v33  ;;  %v920_v36 = vrot.slane %v912_v32, %v2698_v33  ;;  %v911_v37 = vrot.slane %v897_v31, %v2698_v33 }
 0x1d4   : > { %v927_v38 = vrot.slane %v913_v34, %v2698_v33 }
 0x1d5   : > { %v928_v41 = vcombine.low %v904_v35, %v920_v36  ;;  %v929_v44 = vcombine.high %v904_v35, %v920_v36 }
 0x1d6   : > { %v930_v42 = vcombine.low %v911_v37, %v927_v38  ;;  %v931_v46 = vcombine.high %v911_v37, %v927_v38 }
 0x1d9   : > { %v932_v39 = vld [vmem:[#allocation2] sm:$0xff]  ;;  %v933_v43 = vld [vmem:[#allocation2 + $0x8] sm:$0xff] }
 0x1da   : > { %v934_v40 = vld [vmem:[#allocation2 + $0x10] sm:$0xff]  ;;  %2044 = vmatpush3.xpose.msk.msra.mxu1 %vm697_vm2, %v932_v39  ;;  %v935_v45 = vld [vmem:[#allocation2 + $0x18] sm:$0xff] }
 0x1db   : > { %2054 = vmatpush3.xpose.msk.msra.mxu0 %vm697_vm2, %v934_v40  ;;  %2048 = vmatprep.subr.mxu1 %v2457_v0 }
 0x1dc   : > { %2063 = vmatprep.subr.mxu0 %v2457_v0 }
 0x1dd   : > { %2046 = vmatmul.mubr.msk.f32.vlgmr.msra.gmra.mxu1 %vm697_vm2, %v928_v41 }
 0x1de   : > { %2056 = vmatmul.mubr.msk.f32.vlgmr.msra.gmra.mxu0 %vm697_vm2, %v930_v42  ;;  %2049 = vmatpush3.xpose.msk.msra.mxu1 %vm697_vm2, %v933_v43 }
 0x1df   : > { %2050 = vmatprep.mubr.msk.f32.mxu1 %vm2458_vm0, %v2457_v0  ;;  %2058 = vmatprep.subr.mxu1 %v2457_v0 }
 0x1e0   : > { %2065 = vmatprep.mubr.msk.f32.mxu0 %vm2458_vm0, %v2457_v0 }
 0x1e1   : > { %2051 = vmatmul.mubr.msk.f32.vlgmr.msra.gmra.mxu1 %vm697_vm2, %v929_v44 }
 0x1e2   : > { %2059 = vmatpush3.xpose.msk.msra.mxu1 %vm697_vm2, %v935_v45  ;;  %2060 = vmatprep.mubr.msk.f32.mxu1 %vm2458_vm0, %v2457_v0 }
 0x1e3   : > { %2068 = vmatprep.subr.mxu1 %v2457_v0 }
 0x1e5   : > { %2061 = vmatmul.mubr.msk.f32.vlgmr.msra.gmra.mxu1 %vm697_vm2, %v931_v46 }
 0x1e6   : > { %2070 = vmatprep.mubr.msk.f32.mxu1 %vm2458_vm0, %v2457_v0 }
 0x22e   : > { %v552_v48 = vpop.permute.xlu1 %551 }
 0x232   : > { %v556_v49 = vpop.permute.xlu1 %555  ;;  %v554_v50 = vpop.permute.xlu0 %553 }
 0x233   : > { %v577_v51 = vcombine.low %v552_v48, %v556_v49  ;;  %v578_v52 = vcombine.high %v552_v48, %v556_v49  ;;  %v561_v53 = vcombine.low %v550_v47, %v554_v50  ;;  %v562_v54 = vcombine.high %v550_v47, %v554_v50 }
 0x235   : > { %v585_v55 = vrot.slane %v577_v51, %v2696_v26  ;;  %v592_v56 = vrot.slane %v578_v52, %v2696_v26  ;;  %v569_v57 = vrot.slane %v561_v53, %v2696_v26  ;;  %v576_v58 = vrot.slane %v562_v54, %v2696_v26 }
 0x237   : > { %v593_v59 = vcombine.low %v569_v57, %v585_v55  ;;  %v594_v60 = vcombine.high %v569_v57, %v585_v55  ;;  %v609_v61 = vcombine.low %v576_v58, %v592_v56  ;;  %v610_v62 = vcombine.high %v576_v58, %v592_v56 }
 0x239   : > { %v601_v63 = vrot.slane %v593_v59, %v2698_v33  ;;  %v608_v1 = vrot.slane %v594_v60, %v2698_v33  ;;  %v617_v2 = vrot.slane %v609_v61, %v2698_v33  ;;  %v624_v3 = vrot.slane %v610_v62, %v2698_v33  ;;  %v1737_v62 = vld [vmem:[#allocation12 + $0x18] sm:$0xff] }
 0x23b   : > { %v629_v4 = vcombine.low %v601_v63, %v608_v1  ;;  %v1966_v5 = vcombine.high %v601_v63, %v608_v1  ;;  %v645_v6 = vcombine.low %v617_v2, %v624_v3  ;;  %v1967_v7 = vcombine.high %v617_v2, %v624_v3 }
 0x23d   : > { %v636_v8 = vrot.slane %v629_v4, %v2696_v26  ;;  %v644_v9 = vrot.slane %v1966_v5, %v2696_v26  ;;  %v652_v10 = vrot.slane %v645_v6, %v2696_v26  ;;  %v660_v11 = vrot.slane %v1967_v7, %v2696_v26 }
 0x23f   : > { %v661_v12 = vcombine.low %v636_v8, %v644_v9  ;;  %v662_v13 = vcombine.high %v636_v8, %v644_v9  ;;  %v677_v14 = vcombine.low %v652_v10, %v660_v11  ;;  %v678_v15 = vcombine.high %v652_v10, %v660_v11 }
 0x241   : > { %v669_v16 = vrot.slane %v661_v12, %v2698_v33  ;;  %v676_v17 = vrot.slane %v662_v13, %v2698_v33  ;;  %v685_v18 = vrot.slane %v677_v14, %v2698_v33  ;;  %v692_v19 = vrot.slane %v678_v15, %v2698_v33 }
 0x243   : > { %v693_v20 = vcombine.low %v669_v16, %v685_v18  ;;  %v694_v21 = vcombine.high %v669_v16, %v685_v18  ;;  %v695_v22 = vcombine.low %v676_v17, %v692_v19  ;;  %v696_v23 = vcombine.high %v676_v17, %v692_v19 }
 0x245   : > { %702 = vst.msk [vmem:[#allocation3] sm:$0xff] %vm697_vm2, %v693_v20  ;;  %703 = vst.msk [vmem:[#allocation3 + $0x8] sm:$0xff] %vm697_vm2, %v694_v21 }
 0x246   : > { %704 = vst.msk [vmem:[#allocation3 + $0x10] sm:$0xff] %vm697_vm2, %v695_v22  ;;  %705 = vst.msk [vmem:[#allocation3 + $0x18] sm:$0xff] %vm697_vm2, %v696_v23 }
 0x24c   : > { %v936_v24 = vld [vmem:[#allocation3] sm:$0xff]  ;;  %v937_v25 = vld [vmem:[#allocation3 + $0x8] sm:$0xff] }
 0x24d   : > { %2064 = vmatpush3.msra.mxu0 %v936_v24  ;;  %2069 = vmatpush3.msra.mxu1 %v937_v25  ;;  %v938_v53 = vld [vmem:[#allocation3 + $0x10] sm:$0xff]  ;;  %v939_v57 = vld [vmem:[#allocation3 + $0x18] sm:$0xff] }
 0x24e   : > { %2073 = vmatprep.subr.mxu0 %v2457_v0  ;;  %2078 = vmatprep.subr.mxu1 %v2457_v0 }
 0x29d   : > { %v1013_v27 = vpop.f32.mrf.mxu1 }
 0x29e   : > { %v1165_v28 = vpop.f32.mrf.mxu0  ;;  %v1245_v29 = vsel %vm697_vm2, %v1013_v27, -inf }
 0x29f   : > { %1246 = vmax.xlane.f32.xlu0 %v1245_v29  ;;  %v2047_v30 = vpop.f32.mrf.mxu1  ;;  %v1251_v35 = vsel %vm697_vm2, %v1165_v28, -inf }
 0x2a0   : > { %v2057_v31 = vpop.f32.mrf.mxu0 }
 0x2a1   : > { %v1089_v32 = vpop.f32.mrf.mxu1 }
 0x2a2   : > { %v1248_v34 = vsel %vm697_vm2, %v1089_v32, -inf }
 0x2a3   : > { %1249 = vmax.xlane.f32.xlu1 %v1248_v34  ;;  %v2052_v36 = vpop.f32.mrf.mxu1  ;;  %1252 = vmax.xlane.f32.xlu0 %v1251_v35  ;;  %v1736_v34 = vld [vmem:[#allocation12 + $0x10] sm:$0xff]  ;;  %v1735_v35 = vld [vmem:[#allocation12 + $0x8] sm:$0xff] }
 0x2a5   : > { %v1241_v37 = vpop.f32.mrf.mxu1 }
 0x2a6   : > { %v1254_v38 = vsel %vm697_vm2, %v1241_v37, -inf }
 0x2a7   : > { %1255 = vmax.xlane.f32.xlu1 %v1254_v38  ;;  %v2062_v39 = vpop.f32.mrf.mxu1 }
 0x328   : > { %v1247_v40 = vpop.xlane.xlu0 %1246 }
 0x329   : > { %v1257_v41 = vsub.f32 %v1013_v27, %v1247_v40 }
 0x32b   : > { %v1261_v42 = vmul.f32 1.442695, %v1257_v41 }
 0x32c   : > { %v1250_v43 = vpop.xlane.xlu1 %1249  ;;  %v1253_v44 = vpop.xlane.xlu0 %1252 }
 0x32d   : > { %2206 = vpow2.f32 %v1261_v42  ;;  %v1258_v45 = vsub.f32 %v1089_v32, %v1250_v43  ;;  %v1259_v46 = vsub.f32 %v1165_v28, %v1253_v44  ;;  %v1734_v44 = vld [vmem:[#allocation12] sm:$0xff] }
 0x32f   : > { %v1263_v47 = vmul.f32 1.442695, %v1258_v45  ;;  %v1265_v48 = vmul.f32 1.442695, %v1259_v46 }
 0x330   : > { %v1256_v49 = vpop.xlane.xlu1 %1255 }
 0x331   : > { %2208 = vpow2.f32 %v1263_v47  ;;  %v1260_v50 = vsub.f32 %v1241_v37, %v1256_v49 }
 0x332   : > { %2210 = vpow2.f32 %v1265_v48 }
 0x333   : > { %v1267_v51 = vmul.f32 1.442695, %v1260_v50 }
 0x335   : > { %2212 = vpow2.f32 %v1267_v51 }
 0x33a   : > { %v2207_v52 = vpop.eup %2206 }
 0x33b   : > { %2066 = vmatmul.mubr.msk.f32.vlgmr.msra.gmra.mxu0 %vm697_vm2, %v2207_v52  ;;  %v1269_v54 = vsel %vm697_vm2, %v2207_v52, 0.0 }
 0x33c   : > { %2074 = vmatpush3.msra.mxu0 %v938_v53  ;;  %1270 = vadd.xlane.f32.xlu0 %v1269_v54 }
 0x33d   : > { %2075 = vmatprep.mubr.msk.f32.mxu0 %vm2458_vm0, %v2457_v0  ;;  %2083 = vmatprep.subr.mxu0 %v2457_v0 }
 0x33e   : > { %v2209_v55 = vpop.eup %2208 }
 0x33f   : > { %v2211_v56 = vpop.eup %2210  ;;  %2071 = vmatmul.mubr.msk.f32.vlgmr.msra.gmra.mxu1 %vm697_vm2, %v2209_v55  ;;  %v1272_v58 = vsel %vm697_vm2, %v2209_v55, 0.0 }
 0x340   : > { %2076 = vmatmul.mubr.msk.f32.vlgmr.msra.gmra.mxu0 %vm697_vm2, %v2211_v56  ;;  %2079 = vmatpush3.msra.mxu1 %v939_v57  ;;  %v1275_v59 = vsel %vm697_vm2, %v2211_v56, 0.0 }
 0x341   : > { %1273 = vadd.xlane.f32.xlu0 %v1272_v58  ;;  %1276 = vadd.xlane.f32.xlu1 %v1275_v59 }
 0x342   : > { %v2213_v60 = vpop.eup %2212  ;;  %2080 = vmatprep.mubr.msk.f32.mxu1 %vm2458_vm0, %v2457_v0  ;;  %2091 = vmatprep.mubr.msk.f32.mxu0 %vm2458_vm0, %v2457_v0 }
 0x343   : > { %2081 = vmatmul.mubr.msk.f32.vlgmr.msra.gmra.mxu1 %vm697_vm2, %v2213_v60  ;;  %v1278_v61 = vsel %vm697_vm2, %v2213_v60, 0.0  ;;  %2084 = vmatpush3.msra.mxu0 %v1737_v62 }
 0x344   : > { %2085 = vmatprep.subr.mxu0 %v2457_v0 }
 0x345   : > { %1279 = vadd.xlane.f32.xlu0 %v1278_v61  ;;  %2086 = vmatpush3.msra.mxu0 %v1736_v34 }
 0x346   : > { %2087 = vmatprep.subr.mxu0 %v2457_v0 }
 0x347   : > { %2088 = vmatpush3.msra.mxu0 %v1735_v35 }
 0x348   : > { %2089 = vmatprep.subr.mxu0 %v2457_v0 }
 0x349   : > { %2090 = vmatpush3.msra.mxu0 %v1734_v44 }
 0x3c5   : > { %v1271_v63 = vpop.xlane.xlu0 %1270 }
 0x3ca   : > { %v1274_v1 = vpop.xlane.xlu0 %1273  ;;  %v1277_v2 = vpop.xlane.xlu1 %1276 }
 0x3cb   : > { %2214 = vrcp.f32 %v1277_v2 }
 0x3cc   : > { %2216 = vrcp.f32 %v1271_v63 }
 0x3cd   : > { %2218 = vrcp.f32 %v1274_v1 }
 0x3ce   : > { %v1280_v3 = vpop.xlane.xlu0 %1279 }
 0x3cf   : > { %2220 = vrcp.f32 %v1280_v3 }
 0x3d8   : > { %v2215_v7 = vpop.eup %2214 }
 0x3d9   : > { %v2217_v9 = vpop.eup %2216 }
 0x3da   : > { %v2219_v12 = vpop.eup %2218 }
 0x3dc   : > { %v2221_v15 = vpop.eup %2220 }
 0x3fb   : > { %v1350_v4 = vpop.f32.mrf.mxu0 }
 0x3fc   : > { %v1577_v13 = vmul.f32 %v2217_v9, %v1350_v4 }
 0x3fd   : > { %v2067_v5 = vpop.f32.mrf.mxu0 }
 0x3ff   : > { %v1423_v6 = vpop.f32.mrf.mxu1 }
 0x400   : > { %v1496_v8 = vpop.f32.mrf.mxu0  ;;  %v1578_v17 = vmul.f32 %v2219_v12, %v1423_v6 }
 0x401   : > { %v1579_v10 = vmul.f32 %v2215_v7, %v1496_v8  ;;  %v2072_v11 = vpop.f32.mrf.mxu1 }
 0x402   : > { %v2077_v14 = vpop.f32.mrf.mxu0 }
 0x403   : > { %v1569_v16 = vpop.f32.mrf.mxu1  ;;  %v1581_v18 = vcombine.low %v1577_v13, %v1579_v10  ;;  %v1582_v19 = vcombine.high %v1577_v13, %v1579_v10 }
 0x404   : > { %v1580_v20 = vmul.f32 %v2221_v15, %v1569_v16 }
 0x405   : > { %v2082_v21 = vpop.f32.mrf.mxu1  ;;  %v1589_v24 = vrot.slane %v1581_v18, %v2696_v26  ;;  %v1596_v25 = vrot.slane %v1582_v19, %v2696_v26 }
 0x406   : > { %v1597_v22 = vcombine.low %v1578_v17, %v1580_v20  ;;  %v1598_v23 = vcombine.high %v1578_v17, %v1580_v20 }
 0x408   : > { %v1605_v27 = vrot.slane %v1597_v22, %v2696_v26  ;;  %v1612_v28 = vrot.slane %v1598_v23, %v2696_v26 }
 0x40a   : > { %v1613_v29 = vcombine.low %v1589_v24, %v1605_v27  ;;  %v1614_v30 = vcombine.high %v1589_v24, %v1605_v27  ;;  %v1629_v31 = vcombine.low %v1596_v25, %v1612_v28  ;;  %v1630_v32 = vcombine.high %v1596_v25, %v1612_v28 }
 0x40c   : > { %v1621_v36 = vrot.slane %v1613_v29, %v2698_v33  ;;  %v1628_v37 = vrot.slane %v1614_v30, %v2698_v33  ;;  %v1637_v38 = vrot.slane %v1629_v31, %v2698_v33  ;;  %v1644_v39 = vrot.slane %v1630_v32, %v2698_v33 }
 0x40e   : > { %v1649_v40 = vcombine.low %v1621_v36, %v1628_v37  ;;  %v1983_v41 = vcombine.high %v1621_v36, %v1628_v37  ;;  %v1665_v42 = vcombine.low %v1637_v38, %v1644_v39  ;;  %v1984_v43 = vcombine.high %v1637_v38, %v1644_v39 }
 0x410   : > { %v1656_v45 = vrot.slane %v1649_v40, %v2696_v26  ;;  %v1664_v46 = vrot.slane %v1983_v41, %v2696_v26  ;;  %v1672_v47 = vrot.slane %v1665_v42, %v2696_v26  ;;  %v1680_v48 = vrot.slane %v1984_v43, %v2696_v26 }
 0x412   : > { %v1682_v49 = vcombine.high %v1656_v45, %v1664_v46  ;;  %v1698_v50 = vcombine.high %v1672_v47, %v1680_v48  ;;  %v1681_v51 = vcombine.low %v1656_v45, %v1664_v46  ;;  %v1697_v52 = vcombine.low %v1672_v47, %v1680_v48 }
 0x414   : > { %v1696_v53 = vrot.slane %v1682_v49, %v2698_v33  ;;  %v1712_v54 = vrot.slane %v1698_v50, %v2698_v33  ;;  %v1689_v0 = vrot.slane %v1681_v51, %v2698_v33  ;;  %v1705_v55 = vrot.slane %v1697_v52, %v2698_v33 }
 0x416   : > { %v1715_v56 = vcombine.low %v1696_v53, %v1712_v54  ;;  %v1714_v57 = vcombine.high %v1689_v0, %v1705_v55  ;;  %v1713_v58 = vcombine.low %v1689_v0, %v1705_v55  ;;  %v1716_v26 = vcombine.high %v1696_v53, %v1712_v54 }
 0x418   : > { %1722 = vrot.lane.b32.xlu0 %v1715_v56, %s2465_s10  ;;  %1718 = vrot.lane.b32.xlu1 %v1714_v57, %s2466_s14 }
 0x41c   : > { %1726 = vrot.lane.b32.xlu1 %v1716_v26, %s2467_s16 }
 0x48a   : > { %v1719_v59 = vpop.permute.xlu1 %1718  ;;  %v1723_v60 = vpop.permute.xlu0 %1722 }
 0x48b   : > { %v1729_v61 = vsel %vm697_vm2, %v1713_v58, %v1719_v59 }
 0x48c   : > { %v1731_v62 = vsel %vm1730_vm3, %v1729_v61, %v1723_v60 }
 0x48e   : > { %v1727_v33 = vpop.permute.xlu1 %1726 }
 0x48f   : > { %v1733_v63 = vsel %vm1732_vm4, %v1731_v62, %v1727_v33 }
 0x490   : > { %2092 = vmatmul.mubr.msk.f32.vlgmr.msra.gmra.mxu0 %vm329_vm1, %v1733_v63 }
 0x550   : > { %v1807_v1 = vpop.f32.mrf.mxu0 }
 0x551   : > { %1811 = vst.msk [vmem:[%s319_s11] sm:$0xff] %vm329_vm1, %v1807_v1 }
 0x552   : > { %v2093_v2 = vpop.f32.mrf.mxu0 }
 0x553   : > { %2369 = shalt.err (!%p2366_p7)
}
 0x554   : > { %s2370_s30 = scalar_lea.hbm %s2825_s8, 128  ;;  %s2374_s10 = scalar_lea.hbm %s2879_s5, 256 }
 0x555   : > { %p2371_p10 = scmp.ne.s32.totalorder %s2825_s8, %s2370_s30  ;;  %p2375_p3 = scmp.lt.s32.totalorder %s2825_s8, %s2879_s5 }
 0x556   : > { %p2376_p1 = scmp.lt.s32.totalorder %s2374_s10, %s2370_s30 }
 0x557   : > { %p2372_p9 = pnand %p2371_p10, %p2624_p2 }
 0x558   : > { %p2377_p4 = por %p2376_p1, %p2375_p3 }
 0x559   : > { %p2373_p13 = pneg %p2372_p9 }
 0x55b   : > { %p2378_p8 = pnand %p2377_p4, %p2373_p13 }
 0x55d   : > { %2381 = shalt.err (!%p2378_p8)
}
 0x55e   : > { %2110 = dma.vmem_to_hbm [thread:$0]  (%p2624_p2), %s2827_s27, 128, %s2825_s8, %s1813_s1  }
 0x55f PF: > { %s1839_s11 = sand.u32 1, %s2428_s18   ;;  %p2904_p6 = scmp.ne.s32.totalorder %s2891_s29, 0 }
 0x560   : > { %p2905_p12 = scmp.ge.s32.totalorder %s2448_s23, 2  ;;  %s1840_s24 = scalar_lea.sflag [#allocation6], %s1839_s11 }
 0x562   : > { %p2130_p0 = pnand %p2905_p12, %p2904_p6 }
 0x564   : > { %p2131_p5 = pneg %p2130_p0 }
 0x566   : > { %2423 = dma.done.wait (%p2131_p5), %s1840_s24, 128  }
 0x567   : > { %2425 = vsyncadd (%p2131_p5), %s1840_s24, 4294967168  ;;  %s23_s23 = sadd.s32 1, %s2448_s23   ;;  %s2906_s18 = smov %s2432_s19 }
 0x568   : > { %p20_p11 = scmp.ge.s32.totalorder %s23_s23, 4   ;;  %s2907_s19 = smov %s2436_s20 }
 0x569   : > { %s2908_s20 = smov %s2633_s7  ;;  %s2909_s21 = smov %s2444_s22 }
 0x56a   : > { %s2910_s22 = smov %s2912_s15  ;;  %22 = sbr.rel (!%p20_p11) target bundleno = 10 (0xa), region = 106 }
 0x56f   :  { %1845 = vsyncpa [#allocation5], 1 }
 0x570   :  { %1847 = vsyncpa [#allocation5 + $0x1], 1 }
 0x571   :  { %1848 = vsyncpa [#allocation8], 1 }
 0x572   :  { %1849 = vsyncpa [#allocation11], 1 }
 0x573   :  { %1850 = vsyncpa [#allocation6], 1 }
 0x574   :  { %1852 = vsyncpa [#allocation6 + $0x1], 1 }

</bundles_post_ra>
